<compile_context>
chip_gen: v7x
topology: tpu7x:2x2x1
jax: 0.10.0
libtpu: 0.0.40
codegen_flags: <defaults>
</compile_context>

<pallas_src>
import jax
import jax.numpy as jnp
from jax import lax
from jax.experimental import pallas as pl
from jax.experimental.pallas import tpu as pltpu


def _round_up(v, m):
    return ((v + m - 1) // m) * m


def decoder_kernel(x_ref, w_ref, b_ref, o_ref):
    """One N-tile of  y = x @ W^T + b.

    x_ref : (batch, expr_dim)  -- whole (small) activation, resident each step
    w_ref : (TN, expr_dim)     -- weight tile, native PyTorch (out, in) layout
    b_ref : (1, TN)
    o_ref : (batch, TN)
    """
    # Contract x dim 1 with w dim 1 -> (batch, TN).  The transposed RHS is
    # handled in-VMEM (XLU/MXU); the weight is never transposed in HBM.
    acc = lax.dot_general(
        x_ref[...], w_ref[...],
        dimension_numbers=(((1,), (1,)), ((), ())),
        preferred_element_type=jnp.float32)
    o_ref[...] = (acc + b_ref[...]).astype(o_ref.dtype)


def decoder_forward(x, weight, bias, num_vertices, *, tn=512,
                    vmem_limit_bytes=None):
    """Pallas equivalent of Decoder.forward.

    x      : (..., expression_dim)              float32
    weight : (3*num_vertices, expression_dim)   float32  (PyTorch Linear layout)
    bias   : (3*num_vertices,)                  float32
    returns: (-1, num_vertices, 3)              float32
    """
    out_features, expr_dim = weight.shape
    assert out_features == 3 * num_vertices

    # torch.Linear acts on the last dim; the final reshape(-1, V, 3) flattens
    # leading dims anyway, so flatten up front.
    x2 = x.reshape(-1, expr_dim)
    batch = x2.shape[0]

    # ---- lane-dense tiling of the output-feature axis --------------------
    n128 = _round_up(out_features, 128)
    tn = min(_round_up(tn, 128), n128)          # tile width, multiple of 128
    padded_n = _round_up(out_features, tn)      # grid covers the padded range
    grid = (padded_n // tn,)

    # Zero-pad weight rows / bias so every tile is full width (no masked
    # partial stores, no ragged last tile).
    if padded_n != out_features:
        weight = jnp.pad(weight, ((0, padded_n - out_features), (0, 0)))
        bias = jnp.pad(bias, (0, padded_n - out_features))
    b2 = bias.reshape(1, padded_n)

    itemsize = jnp.dtype(x.dtype).itemsize
    cost = pl.CostEstimate(
        flops=2 * batch * expr_dim * padded_n,
        transcendentals=0,
        bytes_accessed=(weight.size + x2.size + b2.size + batch * padded_n)
        * itemsize,
    )

    y = pl.pallas_call(
        decoder_kernel,
        out_shape=jax.ShapeDtypeStruct((batch, padded_n), x.dtype),
        grid_spec=pltpu.PrefetchScalarGridSpec(
            num_scalar_prefetch=0,
            grid=grid,
            in_specs=[
                # activation: tiny, resident across all N tiles
                pl.BlockSpec((batch, expr_dim), lambda j: (0, 0)),
                # weight tile j (rows j*tn : (j+1)*tn), contiguous in HBM
                pl.BlockSpec((tn, expr_dim), lambda j: (j, 0)),
                # bias tile j
                pl.BlockSpec((1, tn), lambda j: (0, j)),
            ],
            out_specs=pl.BlockSpec((batch, tn), lambda j: (0, j)),
        ),
        compiler_params=pltpu.CompilerParams(
            dimension_semantics=("parallel",),
            vmem_limit_bytes=vmem_limit_bytes),
        cost_estimate=cost,
    )(x2, weight, b2)

    # Drop the zero-padded columns, then the pure-view reshape to (-1, V, 3).
    return y[:, :out_features].reshape(-1, num_vertices, 3)


if __name__ == "__main__":
    key = jax.random.PRNGKey(0)

    def run_case(batch, expression_dim, num_vertices, k):
        kx, kw, kb = jax.random.split(k, 3)
        x = jax.random.normal(kx, (batch, expression_dim), dtype=jnp.float32)
        weight = jax.random.normal(
            kw, (3 * num_vertices, expression_dim), dtype=jnp.float32) * 0.02
        bias = jax.random.normal(
            kb, (3 * num_vertices,), dtype=jnp.float32) * 0.01

        out = decoder_forward(x, weight, bias, num_vertices)
        out = jax.block_until_ready(out)

        # Reference: plain JAX (same math as torch Linear + reshape).
        ref = (x @ weight.T + bias).reshape(-1, num_vertices, 3)
        assert out.shape == (batch, num_vertices, 3), out.shape
        assert jnp.allclose(out, ref, atol=1e-4, rtol=1e-4), \
            "mismatch vs reference"

    k1, k2 = jax.random.split(key)
    # out_features = 192 (< one 128-aligned tile): exercises the padding path.
    run_case(batch=2, expression_dim=32, num_vertices=64, k=k1)
    # out_features = 1023 (not a multiple of 128): multi-tile grid + padding
    # + slice-back before the (V, 3) reshape.
    run_case(batch=2, expression_dim=32, num_vertices=341, k=k2)

    print("KERNEL_OK")
</pallas_src>

<mosaic_0001>
module attributes {stable_mosaic.version = 11 : i64} {
  func.func @decoder_kernel(%arg0: i32, %arg1: memref<2x32xf32, #tpu.memory_space<vmem>>, %arg2: memref<256x32xf32, #tpu.memory_space<vmem>>, %arg3: memref<1x256xf32, #tpu.memory_space<vmem>>, %arg4: memref<2x256xf32, #tpu.memory_space<vmem>>) attributes {dimension_semantics = [#tpu.dimension_semantics<parallel>], iteration_bounds = array<i64: 1>, scalar_prefetch = 0 : i64, scratch_operands = 0 : i64, tpu.core_type = #tpu.core_type<tc>, window_params = [{pipeline_mode = #tpu.pipeline_mode<synchronous>, transform_indices = @transform_0, window_bounds = array<i64: 2, 32>}, {transform_indices = @transform_1, window_bounds = array<i64: 256, 32>}, {transform_indices = @transform_2, window_bounds = array<i64: 1, 256>}, {transform_indices = @transform_3, window_bounds = array<i64: 2, 256>}]} {
    %c0 = arith.constant 0 : index
    %c0_0 = arith.constant 0 : index
    %0 = vector.load %arg1[%c0, %c0_0] : memref<2x32xf32, #tpu.memory_space<vmem>>, vector<2x32xf32>
    %c0_1 = arith.constant 0 : index
    %c0_2 = arith.constant 0 : index
    %1 = vector.load %arg2[%c0_1, %c0_2] : memref<256x32xf32, #tpu.memory_space<vmem>>, vector<256x32xf32>
    %cst = arith.constant dense<0.000000e+00> : vector<2x256xf32>
    %2 = tpu.matmul %0, %1, %cst {dimension_numbers = #tpu.dot_dimension_numbers<[1], [1], [0], [0], [0, 0, 1, 0], [], []>} : vector<2x32xf32>, vector<256x32xf32>, vector<2x256xf32> -> vector<2x256xf32>
    %c0_3 = arith.constant 0 : index
    %c0_4 = arith.constant 0 : index
    %3 = vector.load %arg3[%c0_3, %c0_4] : memref<1x256xf32, #tpu.memory_space<vmem>>, vector<1x256xf32>
    %4 = vector.broadcast %3 : vector<1x256xf32> to vector<2x256xf32>
    %5 = arith.addf %2, %4 : vector<2x256xf32>
    %c0_5 = arith.constant 0 : index
    %c0_6 = arith.constant 0 : index
    %6 = vector.load %arg4[%c0_5, %c0_6] : memref<2x256xf32, #tpu.memory_space<vmem>>, vector<2x256xf32>
    tpu.vector_store %arg4[%c0_5, %c0_6], %5 {strides = array<i32>} : memref<2x256xf32, #tpu.memory_space<vmem>>, vector<2x256xf32>,
    return
  }
  func.func @transform_0(%arg0: i32) -> (i32, i32) {
    %c0_i32 = arith.constant 0 : i32
    %c0_i32_0 = arith.constant 0 : i32
    %c0_i32_1 = arith.constant 0 : i32
    return %c0_i32, %c0_i32_0 : i32, i32
  }
  func.func @transform_1(%arg0: i32) -> (i32, i32) {
    %c0_i32 = arith.constant 0 : i32
    %c0_i32_0 = arith.constant 0 : i32
    return %arg0, %c0_i32 : i32, i32
  }
  func.func @transform_2(%arg0: i32) -> (i32, i32) {
    %c0_i32 = arith.constant 0 : i32
    %c0_i32_0 = arith.constant 0 : i32
    return %c0_i32, %arg0 : i32, i32
  }
  func.func @transform_3(%arg0: i32) -> (i32, i32) {
    %c0_i32 = arith.constant 0 : i32
    %c0_i32_0 = arith.constant 0 : i32
    return %c0_i32, %arg0 : i32, i32
  }
}

</mosaic_0001>

<bundles_post_ra>
// kernel: tpu_custom_call.1
= control target key start
LH: loop header
LB: loop body
LE: loop exit
PB: predicated region body
PF: predicated region fallthrough
CT: control target
= control target key end

     0   :  { %vm60_vm0 = vcmask 261120   ;;  %s573_s0 = inlined_call_operand.vmem [shape: f32[2,32], index: 0, kind: input, shape index: {}]   ;;  %s574_s1 = inlined_call_operand.vmem [shape: f32[256,32], index: 1, kind: input, shape index: {}]   ;;  %s575_s2 = inlined_call_operand.vmem [shape: f32[1,256], index: 2, kind: input, shape index: {}]   ;;  %s576_s3 = inlined_call_operand.hbm [shape: f32[2,256], index: 3, kind: output, shape index: {}]  }
   0x1   :  { %v32_v0 = vld [vmem:[%s574_s1 + $0x80] sm:$0xff]  ;;  %v33_v1 = vld [vmem:[%s574_s1 + $0x88] sm:$0xff]  ;;  %vm430_vm1 = vmpackc.low %vm60_vm0, %vm60_vm0 }
   0x2   :  { %v16_v2 = vld [vmem:[%s574_s1] sm:$0xff]  ;;  %v325_v3 = vpack.c.bf16 %v33_v1, %v32_v0  ;;  %v17_v5 = vld [vmem:[%s574_s1 + $0x8] sm:$0xff]  ;;  %v34_v6 = vld [vmem:[%s574_s1 + $0x90] sm:$0xff] }
   0x3   :  { %v328_v7 = vpack.c.bf16 %v17_v5, %v16_v2  ;;  %v35_v8 = vld [vmem:[%s574_s1 + $0x98] sm:$0xff]  ;;  %v18_v10 = vld [vmem:[%s574_s1 + $0x10] sm:$0xff]  ;;  %v36_v12 = vld [vmem:[%s574_s1 + $0xa0] sm:$0xff] }
   0x4   :  { %327 = vmatprep.subr.msk.bf16.mxu0 %vm430_vm1, %v325_v3  ;;  %v331_v9 = vpack.c.bf16 %v35_v8, %v34_v6  ;;  %v19_v11 = vld [vmem:[%s574_s1 + $0x18] sm:$0xff]  ;;  %v37_v13 = vld [vmem:[%s574_s1 + $0xa8] sm:$0xff]  ;;  %v15_v16 = vld [vmem:[%s573_s0] sm:$0x3] }
   0x5   :  { %330 = vmatpush3.bf16.xpose.msk.msra.mxu0 %vm430_vm1, %v328_v7  ;;  %v334_v14 = vpack.c.bf16 %v19_v11, %v18_v10  ;;  %v337_v15 = vpack.c.bf16 %v37_v13, %v36_v12 }
   0x6   :  { %333 = vmatprep.subr.msk.bf16.mxu0 %vm430_vm1, %v331_v9 }
   0x7   :  { %8 = vsyncpa [#allocation3], 0  ;;  %323 = vmatprep.mubr.msk.f32.mxu0 %vm60_vm0, %v15_v16  ;;  %v20_v17 = vld [vmem:[%s574_s1 + $0x20] sm:$0xff]  ;;  %v21_v18 = vld [vmem:[%s574_s1 + $0x28] sm:$0xff]  ;;  %v50_v50 = vlaneseq }
   0x8   :  { %v38_v19 = vld [vmem:[%s574_s1 + $0xb0] sm:$0xff]  ;;  %v39_v20 = vld [vmem:[%s574_s1 + $0xb8] sm:$0xff]  ;;  %v340_v21 = vpack.c.bf16 %v21_v18, %v20_v17  ;;  %v40_v25 = vld [vmem:[%s574_s1 + $0xc0] sm:$0xff] }
   0x9   :  { %v343_v22 = vpack.c.bf16 %v39_v20, %v38_v19  ;;  %v22_v23 = vld [vmem:[%s574_s1 + $0x30] sm:$0xff]  ;;  %v23_v24 = vld [vmem:[%s574_s1 + $0x38] sm:$0xff]  ;;  %v41_v26 = vld [vmem:[%s574_s1 + $0xc8] sm:$0xff]  ;;  %v51_v51 = vshrl.u32 %v50_v50, 7 }
   0xa   :  { %v346_v27 = vpack.c.bf16 %v23_v24, %v22_v23  ;;  %v349_v28 = vpack.c.bf16 %v41_v26, %v40_v25  ;;  %v24_v29 = vld [vmem:[%s574_s1 + $0x40] sm:$0xff]  ;;  %v25_v30 = vld [vmem:[%s574_s1 + $0x48] sm:$0xff]  ;;  %v42_v31 = vld [vmem:[%s574_s1 + $0xd0] sm:$0xff] }
   0xb   :  { %v43_v32 = vld [vmem:[%s574_s1 + $0xd8] sm:$0xff]  ;;  %v352_v33 = vpack.c.bf16 %v25_v30, %v24_v29  ;;  %v26_v35 = vld [vmem:[%s574_s1 + $0x50] sm:$0xff]  ;;  %v44_v37 = vld [vmem:[%s574_s1 + $0xe0] sm:$0xff]  ;;  %v52_v52 = vsub.s32 0, %v51_v51  ;;  %v56_v54 = vsub.s32 1, %v51_v51 }
   0xc   :  { %v355_v34 = vpack.c.bf16 %v43_v32, %v42_v31  ;;  %v27_v36 = vld [vmem:[%s574_s1 + $0x58] sm:$0xff]  ;;  %v45_v38 = vld [vmem:[%s574_s1 + $0xe8] sm:$0xff]  ;;  %v28_v41 = vld [vmem:[%s574_s1 + $0x60] sm:$0xff] }
   0xd   :  { %336 = vmatpush3.bf16.xpose.msk.msra.mxu0 %vm430_vm1, %v334_v14  ;;  %v358_v39 = vpack.c.bf16 %v27_v36, %v26_v35  ;;  %v361_v40 = vpack.c.bf16 %v45_v38, %v44_v37  ;;  %v29_v42 = vld [vmem:[%s574_s1 + $0x68] sm:$0xff]  ;;  %v46_v43 = vld [vmem:[%s574_s1 + $0xf0] sm:$0xff]  ;;  %v47_v44 = vld [vmem:[%s574_s1 + $0xf8] sm:$0xff] }
   0xe   :  { %339 = vmatprep.subr.msk.bf16.mxu0 %vm430_vm1, %v337_v15  ;;  %v364_v45 = vpack.c.bf16 %v29_v42, %v28_v41  ;;  %v367_v46 = vpack.c.bf16 %v47_v44, %v46_v43  ;;  %v30_v47 = vld [vmem:[%s574_s1 + $0x70] sm:$0xff]  ;;  %v31_v48 = vld [vmem:[%s574_s1 + $0x78] sm:$0xff]  ;;  %v48_v53 = vld [vmem:[%s575_s2] sm:$0x3]  ;;  %s398_s1 = smov [#allocation2]  }
   0xf   :  { %v370_v49 = vpack.c.bf16 %v31_v48, %v30_v47  ;;  %v53_v55 = vrot.slane %v48_v53, %v52_v52  ;;  %v57_v56 = vrot.slane %v48_v53, %v56_v54  ;;  %s249_s24 = sshll.u32 %s398_s1, 4  ;;  %s250_s24 = int_to_ptr.vmem [resolvable:$true] %s249_s24 }
  0x10   :  { %s374_s25 = scalar_lea.vmem %s250_s24, 64  ;;  %p379_p1 = scmp.lt.s32.totalorder %s250_s24, %s250_s24 }
  0x11   :  { %p375_p0 = scmp.ne.s32.totalorder %s250_s24, %s374_s25  ;;  %p380_p2 = scmp.lt.s32.totalorder %s374_s25, %s374_s25 }
  0x13   :  { %p381_p3 = por %p380_p2, %p379_p1 }
  0x15   :  { %342 = vmatpush3.bf16.xpose.msk.msra.mxu0 %vm430_vm1, %v340_v21  ;;  %p382_p4 = pnand %p381_p3, %p375_p0 }
  0x16   :  { %345 = vmatprep.subr.msk.bf16.mxu0 %vm430_vm1, %v343_v22 }
  0x1d   :  { %348 = vmatpush3.bf16.xpose.msk.msra.mxu0 %vm430_vm1, %v346_v27 }
  0x1e   :  { %351 = vmatprep.subr.msk.bf16.mxu0 %vm430_vm1, %v349_v28 }
  0x25   :  { %354 = vmatpush3.bf16.xpose.msk.msra.mxu0 %vm430_vm1, %v352_v33 }
  0x26   :  { %357 = vmatprep.subr.msk.bf16.mxu0 %vm430_vm1, %v355_v34 }
  0x2d   :  { %360 = vmatpush3.bf16.xpose.msk.msra.mxu0 %vm430_vm1, %v358_v39 }
  0x2e   :  { %363 = vmatprep.subr.msk.bf16.mxu0 %vm430_vm1, %v361_v40 }
  0x35   :  { %366 = vmatpush3.bf16.xpose.msk.msra.mxu0 %vm430_vm1, %v364_v45 }
  0x36   :  { %369 = vmatprep.subr.msk.bf16.mxu0 %vm430_vm1, %v367_v46 }
  0x3d   :  { %372 = vmatpush3.bf16.xpose.msk.msra.mxu0 %vm430_vm1, %v370_v49 }
  0x44   :  { %324 = vmatmul.mubr.msk.f32.vlgmr.msra.gmra.mrb[0].mxu0 %vm60_vm0, %v15_v16 }
 0x117   :  { %v226_v57 = vpop.f32.mrb[0].mxu0 }
 0x118   :  { %v227_v58 = vadd.f32 %v226_v57, %v53_v55  ;;  %v228_v59 = vpop.f32.mrb[1].mxu0 }
 0x119   :  { %v229_v60 = vadd.f32 %v228_v59, %v57_v56 }
 0x11b   :  { %v233_v61 = vcombine.low %v227_v58, %v229_v60 }
 0x11d   :  { %290 = vst.sshfl [vmem:[#allocation2] sm:$0x33 pattern:$0x76325410] %v233_v61 }
 0x11e   :  { %385 = shalt.err (!%p382_p4)
}
 0x11f   :  { %s386_s27 = scalar_lea.hbm %s576_s3, 64 }
 0x120   :  { %p387_p5 = scmp.ne.s32.totalorder %s576_s3, %s386_s27  ;;  %p390_p6 = scmp.lt.u32.totalorder %s386_s27, %s576_s3 }
 0x122   :  { %p392_p7 = pnand %p390_p6, %p387_p5 }
 0x124   :  { %395 = shalt.err (!%p392_p7)
}
 0x125   :  { %252 = dma.vmem_to_hbm [thread:$0]  %s250_s24, 64, %s576_s3, [#allocation3]  }
 0x126   :  { %396 = dma.done.wait [#allocation3], 64  }
 0x127   :  { %397 = vsyncadd [#allocation3], 4294967232 }
 0x128   :  { %256 = vsyncpa [#allocation3], 1 }

</bundles_post_ra>
